<compile_context>
chip_gen: v5e
topology: v5e:2x2
jax: 0.10.0
libtpu: 0.0.40
codegen_flags: <defaults>
</compile_context>

<pallas_src>
import functools

import jax
import jax.numpy as jnp
from jax.experimental import pallas as pl
from jax.experimental.pallas import tpu as pltpu


# ---------------------------------------------------------------------------
# Pallas kernel: fused SystemRobots.forward on component planes.
# Plane layout (lane axis = batch):
#   xs        : (4, n_agents, TB)  rows = [px, py, vx, vy]
#   us/vs/ds  : (2, n_agents, TB)  rows = [x-comp, y-comp]
#   xbar      : (4, n_agents, 1)   broadcasts over the batch lanes
# Semantics:
#   u' = u + d
#   x_ = (x - xbar) @ A^T + coef*mask*tanh(x - xbar) + u' @ B^T + xbar
#   y  = x @ C^T + u' @ D^T + v        (D == 0, C = position selector)
# ---------------------------------------------------------------------------
def _system_robots_kernel(h, k_spring, b_damp, mass, coef,
                          xbar_ref, xs_ref, us_ref, vs_ref, ds_ref,
                          xnew_ref, y_ref):
    f32 = jnp.float32

    xs = xs_ref[...].astype(f32)                     # (4, A, TB)
    xbar = xbar_ref[...].astype(f32)                 # (4, A, 1) -> lane bcast
    uu = us_ref[...].astype(f32) + ds_ref[...].astype(f32)   # u' = u + d

    dx = xs - xbar                                   # one VPU sub, all planes
    dp = dx[0:2]                                     # (2, A, TB) positions
    dv = dx[2:4]                                     # (2, A, TB) velocities

    # (x - xbar) @ A^T  with A = I + h*kron(I, A2)   (per-agent 4x4 stencil)
    # + u' @ B^T        with B = h*kron(I, B2)       (per-agent 4x2 stencil)
    p_new = dp + h * dv
    v_new = (dv
             - (h * k_spring / mass) * dp
             - (h * b_damp / mass) * dv
             + (h / mass) * uu)

    # Nonlinear drag coef * mask * tanh(dx), mask = [0,0,1,1] per agent.
    # Trace-time guard: skipped entirely for the linear model (coef == 0).
    if coef != 0.0:
        v_new = v_new + coef * jnp.tanh(dv)

    xnew_ref[0:2, :, :] = (p_new + xbar[0:2]).astype(xnew_ref.dtype)
    xnew_ref[2:4, :, :] = (v_new + xbar[2:4]).astype(xnew_ref.dtype)

    # y = C x + D u' + v ;  C selects positions, D == 0.
    y_ref[...] = (xs[0:2] + vs_ref[...].astype(f32)).astype(y_ref.dtype)


# ---------------------------------------------------------------------------
# Wrapper: layout plumbing (planes) + pallas_call with a batch grid.
# ---------------------------------------------------------------------------
def _to_planes(a, c):
    """(batch, c*n_agents) agent-major -> (c, n_agents, batch)."""
    batch, width = a.shape
    n_agents = width // c
    return jnp.transpose(a.reshape(batch, n_agents, c), (2, 1, 0))


def _from_planes(p):
    """(c, n_agents, batch) -> (batch, c*n_agents) agent-major."""
    c, n_agents, batch = p.shape
    return jnp.transpose(p, (2, 1, 0)).reshape(batch, n_agents * c)


def _pick_batch_tile(batch):
    """Lane-axis tile: big 128-multiples when they divide batch, else full.

    Per-tile VMEM footprint is 16 * n_agents * TB * 4 B (all planes), so even
    TB=2048 with hundreds of agents stays far below the scoped VMEM limit.
    """
    for cand in (2048, 1024, 512, 256, 128):
        if batch % cand == 0 and batch >= 2 * cand:
            return cand
    return batch


def system_robots_forward(params, t, x, u, v, d):
    """Pallas-backed SystemRobots.forward. `t` is unused (kept for parity)."""
    del t
    n_agents = params["n_agents"]
    h, k_s, b_d, mass, coef = (params["h"], params["k"], params["b"],
                               params["mass"], params["coef"])
    batch = x.shape[0]

    xs = _to_planes(x, 4)            # (4, n_agents, batch)
    us = _to_planes(u, 2)            # (2, n_agents, batch)
    vs = _to_planes(v, 2)
    ds = _to_planes(d, 2)
    xbar_p = params["xbar_planes"]   # (4, n_agents, 1)

    TB = _pick_batch_tile(batch)
    grid = (batch // TB,)

    def tiled(c):
        return pl.BlockSpec((c, n_agents, TB), lambda i: (0, 0, i))

    xnew_s, ys = pl.pallas_call(
        functools.partial(_system_robots_kernel, h, k_s, b_d, mass, coef),
        out_shape=(jax.ShapeDtypeStruct((4, n_agents, batch), x.dtype),
                   jax.ShapeDtypeStruct((2, n_agents, batch), x.dtype)),
        grid=grid,
        in_specs=[pl.BlockSpec((4, n_agents, 1), lambda i: (0, 0, 0)),  # xbar (VMEM resident)
                  tiled(4),   # x planes
                  tiled(2),   # u planes
                  tiled(2),   # v planes
                  tiled(2)],  # d planes
        out_specs=(tiled(4), tiled(2)),
        compiler_params=pltpu.CompilerParams(
            dimension_semantics=("parallel",)),
    )(xbar_p, xs, us, vs, ds)

    return _from_planes(xnew_s), _from_planes(ys)


# ---------------------------------------------------------------------------
# Parameters (mirrors SystemRobots.__init__; no dense matrices needed).
# ---------------------------------------------------------------------------
def make_params(xbar, linear=True):
    n = int(xbar.shape[0])
    n_agents = n // 4
    m = 2 * n_agents
    h, mass, k, b = 0.05, 1.0, 1.0, 2.0
    b2 = 0.0 if linear else 0.5
    # Matches the module exactly: h * b2 / self.m (control dim), not / mass.
    coef = float(h * b2 / m)

    xbar_planes = jnp.transpose(
        xbar.reshape(n_agents, 4).astype(jnp.float32))[:, :, None]  # (4, A, 1)

    return {
        "n_agents": n_agents, "n": n, "m": m,
        "h": h, "mass": mass, "k": k, "b": b, "coef": coef,
        "xbar_planes": xbar_planes,
    }


# ---------------------------------------------------------------------------
# Independent dense reference (builds A/B/C/D exactly like the PyTorch module).
# ---------------------------------------------------------------------------
def make_dense_reference(xbar, linear=True):
    n = int(xbar.shape[0])
    n_agents = n // 4
    m = 2 * n_agents
    h, mass, k, b = 0.05, 1.0, 1.0, 2.0
    b2 = 0.0 if linear else 0.5

    eye_a = jnp.eye(n_agents, dtype=jnp.float32)
    B = jnp.kron(eye_a, jnp.array([[0.0, 0.0],
                                   [0.0, 0.0],
                                   [1.0 / mass, 0.0],
                                   [0.0, 1.0 / mass]], dtype=jnp.float32)) * h
    C = jnp.kron(eye_a, jnp.array([[1.0, 0.0, 0.0, 0.0],
                                   [0.0, 1.0, 0.0, 0.0]], dtype=jnp.float32))
    D = jnp.zeros((m, m), dtype=jnp.float32)
    A2 = jnp.block([[jnp.zeros((2, 2)), jnp.eye(2)],
                    [jnp.diag(jnp.array([-k / mass, -k / mass])),
                     jnp.diag(jnp.array([-b / mass, -b / mass]))]]).astype(jnp.float32)
    A = jnp.eye(n, dtype=jnp.float32) + h * jnp.kron(eye_a, A2)
    mask = jnp.tile(jnp.array([0.0, 0.0, 1.0, 1.0], dtype=jnp.float32), n_agents)
    coef = h * b2 / m
    xbar_f = xbar.astype(jnp.float32)

    def forward(t, x, u, v, d):
        del t
        uu = u + d
        dx = x - xbar_f
        x_ = dx @ A.T + coef * mask * jnp.tanh(dx) + uu @ B.T + xbar_f
        y = x @ C.T + uu @ D.T + v
        return x_, y

    return forward


if __name__ == "__main__":
    n_agents = 4
    n = 4 * n_agents            # 16
    m = 2 * n_agents            # 8
    batch = 8

    key = jax.random.PRNGKey(0)
    k_xbar, k_x, k_u, k_v, k_d = jax.random.split(key, 5)
    xbar = jax.random.normal(k_xbar, (n,), dtype=jnp.float32)
    x = jax.random.normal(k_x, (batch, n), dtype=jnp.float32)
    u = jax.random.normal(k_u, (batch, m), dtype=jnp.float32)
    v = jax.random.normal(k_v, (batch, m), dtype=jnp.float32)
    d = jax.random.normal(k_d, (batch, m), dtype=jnp.float32)
    t = 0.0

    # Check both the linear (coef == 0) and nonlinear (coef != 0) paths
    # against an independent dense reference.
    for linear in (True, False):
        params = make_params(xbar, linear=linear)
        x_new, y = jax.block_until_ready(
            system_robots_forward(params, t, x, u, v, d))
        ref_fwd = make_dense_reference(xbar, linear=linear)
        x_ref, y_ref = ref_fwd(t, x, u, v, d)
        assert jnp.allclose(x_new, x_ref, atol=1e-5, rtol=1e-5), \
            f"x_ mismatch (linear={linear})"
        assert jnp.allclose(y, y_ref, atol=1e-5, rtol=1e-5), \
            f"y mismatch (linear={linear})"

    print("KERNEL_OK")
</pallas_src>

<mosaic_0001>
module attributes {stable_mosaic.version = 11 : i64} {
  func.func @_system_robots_kernel(%arg0: i32, %arg1: memref<4x4x1xf32, #tpu.memory_space<vmem>>, %arg2: memref<4x4x8xf32, #tpu.memory_space<vmem>>, %arg3: memref<2x4x8xf32, #tpu.memory_space<vmem>>, %arg4: memref<2x4x8xf32, #tpu.memory_space<vmem>>, %arg5: memref<2x4x8xf32, #tpu.memory_space<vmem>>, %arg6: memref<4x4x8xf32, #tpu.memory_space<vmem>>, %arg7: memref<2x4x8xf32, #tpu.memory_space<vmem>>) attributes {dimension_semantics = [#tpu.dimension_semantics<parallel>], iteration_bounds = array<i64: 1>, scalar_prefetch = 0 : i64, scratch_operands = 0 : i64, tpu.core_type = #tpu.core_type<tc>, window_params = [{pipeline_mode = #tpu.pipeline_mode<synchronous>, transform_indices = @transform_0, window_bounds = array<i64: 4, 4, 1>}, {transform_indices = @transform_1, window_bounds = array<i64: 4, 4, 8>}, {transform_indices = @transform_2, window_bounds = array<i64: 2, 4, 8>}, {transform_indices = @transform_3, window_bounds = array<i64: 2, 4, 8>}, {transform_indices = @transform_4, window_bounds = array<i64: 2, 4, 8>}, {transform_indices = @transform_5, window_bounds = array<i64: 4, 4, 8>}, {transform_indices = @transform_6, window_bounds = array<i64: 2, 4, 8>}]} {
    %c0 = arith.constant 0 : index
    %c0_0 = arith.constant 0 : index
    %c0_1 = arith.constant 0 : index
    %0 = vector.load %arg2[%c0, %c0_0, %c0_1] : memref<4x4x8xf32, #tpu.memory_space<vmem>>, vector<4x4x8xf32>
    %c0_2 = arith.constant 0 : index
    %c0_3 = arith.constant 0 : index
    %c0_4 = arith.constant 0 : index
    %1 = vector.load %arg1[%c0_2, %c0_3, %c0_4] : memref<4x4x1xf32, #tpu.memory_space<vmem>>, vector<4x4x1xf32>
    %c0_5 = arith.constant 0 : index
    %c0_6 = arith.constant 0 : index
    %c0_7 = arith.constant 0 : index
    %2 = vector.load %arg3[%c0_5, %c0_6, %c0_7] : memref<2x4x8xf32, #tpu.memory_space<vmem>>, vector<2x4x8xf32>
    %c0_8 = arith.constant 0 : index
    %c0_9 = arith.constant 0 : index
    %c0_10 = arith.constant 0 : index
    %3 = vector.load %arg5[%c0_8, %c0_9, %c0_10] : memref<2x4x8xf32, #tpu.memory_space<vmem>>, vector<2x4x8xf32>
    %4 = arith.addf %2, %3 : vector<2x4x8xf32>
    %5 = vector.broadcast %1 : vector<4x4x1xf32> to vector<4x4x8xf32>
    %6 = arith.subf %0, %5 : vector<4x4x8xf32>
    %7 = vector.extract_strided_slice %6 {offsets = [0, 0, 0], sizes = [2, 4, 8], strides = [1, 1, 1]} : vector<4x4x8xf32> to vector<2x4x8xf32>
    %8 = vector.extract_strided_slice %6 {offsets = [2, 0, 0], sizes = [2, 4, 8], strides = [1, 1, 1]} : vector<4x4x8xf32> to vector<2x4x8xf32>
    %cst = arith.constant 5.000000e-02 : f32
    %9 = vector.broadcast %cst : f32 to vector<2x4x8xf32>
    %10 = arith.mulf %9, %8 : vector<2x4x8xf32>
    %11 = arith.addf %7, %10 : vector<2x4x8xf32>
    %cst_11 = arith.constant 5.000000e-02 : f32
    %12 = vector.broadcast %cst_11 : f32 to vector<2x4x8xf32>
    %13 = arith.mulf %12, %7 : vector<2x4x8xf32>
    %14 = arith.subf %8, %13 : vector<2x4x8xf32>
    %cst_12 = arith.constant 1.000000e-01 : f32
    %15 = vector.broadcast %cst_12 : f32 to vector<2x4x8xf32>
    %16 = arith.mulf %15, %8 : vector<2x4x8xf32>
    %17 = arith.subf %14, %16 : vector<2x4x8xf32>
    %cst_13 = arith.constant 5.000000e-02 : f32
    %18 = vector.broadcast %cst_13 : f32 to vector<2x4x8xf32>
    %19 = arith.mulf %18, %4 : vector<2x4x8xf32>
    %20 = arith.addf %17, %19 : vector<2x4x8xf32>
    %21 = vector.extract_strided_slice %1 {offsets = [0, 0, 0], sizes = [2, 4, 1], strides = [1, 1, 1]} : vector<4x4x1xf32> to vector<2x4x1xf32>
    %22 = vector.broadcast %21 : vector<2x4x1xf32> to vector<2x4x8xf32>
    %23 = arith.addf %11, %22 : vector<2x4x8xf32>
    %c0_14 = arith.constant 0 : index
    %c0_15 = arith.constant 0 : index
    %c0_16 = arith.constant 0 : index
    %24 = vector.load %arg6[%c0_14, %c0_15, %c0_16] : memref<4x4x8xf32, #tpu.memory_space<vmem>>, vector<2x4x8xf32>
    tpu.vector_store %arg6[%c0_14, %c0_15, %c0_16], %23 {strides = array<i32>} : memref<4x4x8xf32, #tpu.memory_space<vmem>>, vector<2x4x8xf32>,
    %25 = vector.extract_strided_slice %1 {offsets = [2, 0, 0], sizes = [2, 4, 1], strides = [1, 1, 1]} : vector<4x4x1xf32> to vector<2x4x1xf32>
    %26 = vector.broadcast %25 : vector<2x4x1xf32> to vector<2x4x8xf32>
    %27 = arith.addf %20, %26 : vector<2x4x8xf32>
    %c2 = arith.constant 2 : index
    %c0_17 = arith.constant 0 : index
    %c0_18 = arith.constant 0 : index
    %28 = vector.load %arg6[%c2, %c0_17, %c0_18] : memref<4x4x8xf32, #tpu.memory_space<vmem>>, vector<2x4x8xf32>
    tpu.vector_store %arg6[%c2, %c0_17, %c0_18], %27 {strides = array<i32>} : memref<4x4x8xf32, #tpu.memory_space<vmem>>, vector<2x4x8xf32>,
    %29 = vector.extract_strided_slice %0 {offsets = [0, 0, 0], sizes = [2, 4, 8], strides = [1, 1, 1]} : vector<4x4x8xf32> to vector<2x4x8xf32>
    %c0_19 = arith.constant 0 : index
    %c0_20 = arith.constant 0 : index
    %c0_21 = arith.constant 0 : index
    %30 = vector.load %arg4[%c0_19, %c0_20, %c0_21] : memref<2x4x8xf32, #tpu.memory_space<vmem>>, vector<2x4x8xf32>
    %31 = arith.addf %29, %30 : vector<2x4x8xf32>
    %c0_22 = arith.constant 0 : index
    %c0_23 = arith.constant 0 : index
    %c0_24 = arith.constant 0 : index
    %32 = vector.load %arg7[%c0_22, %c0_23, %c0_24] : memref<2x4x8xf32, #tpu.memory_space<vmem>>, vector<2x4x8xf32>
    tpu.vector_store %arg7[%c0_22, %c0_23, %c0_24], %31 {strides = array<i32>} : memref<2x4x8xf32, #tpu.memory_space<vmem>>, vector<2x4x8xf32>,
    return
  }
  func.func @transform_0(%arg0: i32) -> (i32, i32, i32) {
    %c0_i32 = arith.constant 0 : i32
    %c0_i32_0 = arith.constant 0 : i32
    %c0_i32_1 = arith.constant 0 : i32
    %c0_i32_2 = arith.constant 0 : i32
    return %c0_i32, %c0_i32_0, %c0_i32_1 : i32, i32, i32
  }
  func.func @transform_1(%arg0: i32) -> (i32, i32, i32) {
    %c0_i32 = arith.constant 0 : i32
    %c0_i32_0 = arith.constant 0 : i32
    %c0_i32_1 = arith.constant 0 : i32
    return %c0_i32, %c0_i32_0, %arg0 : i32, i32, i32
  }
  func.func @transform_2(%arg0: i32) -> (i32, i32, i32) {
    %c0_i32 = arith.constant 0 : i32
    %c0_i32_0 = arith.constant 0 : i32
    %c0_i32_1 = arith.constant 0 : i32
    return %c0_i32, %c0_i32_0, %arg0 : i32, i32, i32
  }
  func.func @transform_3(%arg0: i32) -> (i32, i32, i32) {
    %c0_i32 = arith.constant 0 : i32
    %c0_i32_0 = arith.constant 0 : i32
    %c0_i32_1 = arith.constant 0 : i32
    return %c0_i32, %c0_i32_0, %arg0 : i32, i32, i32
  }
  func.func @transform_4(%arg0: i32) -> (i32, i32, i32) {
    %c0_i32 = arith.constant 0 : i32
    %c0_i32_0 = arith.constant 0 : i32
    %c0_i32_1 = arith.constant 0 : i32
    return %c0_i32, %c0_i32_0, %arg0 : i32, i32, i32
  }
  func.func @transform_5(%arg0: i32) -> (i32, i32, i32) {
    %c0_i32 = arith.constant 0 : i32
    %c0_i32_0 = arith.constant 0 : i32
    %c0_i32_1 = arith.constant 0 : i32
    return %c0_i32, %c0_i32_0, %arg0 : i32, i32, i32
  }
  func.func @transform_6(%arg0: i32) -> (i32, i32, i32) {
    %c0_i32 = arith.constant 0 : i32
    %c0_i32_0 = arith.constant 0 : i32
    %c0_i32_1 = arith.constant 0 : i32
    return %c0_i32, %c0_i32_0, %arg0 : i32, i32, i32
  }
}

</mosaic_0001>

<bundles_post_ra>
// kernel: tpu_custom_call.1
= control target key start
LH: loop header
LB: loop body
LE: loop exit
PB: predicated region body
PF: predicated region fallthrough
CT: control target
= control target key end

     0   :  { %12 = vsyncpa [#allocation3], 0  ;;  %s420_s0 = inlined_call_operand.vmem [shape: f32[4,4,1], index: 0, kind: input, shape index: {}]   ;;  %s421_s1 = inlined_call_operand.vmem [shape: f32[4,4,8], index: 1, kind: input, shape index: {}]   ;;  %s422_s2 = inlined_call_operand.hbm [shape: f32[2,4,8], index: 2, kind: input, shape index: {}]   ;;  %s423_s3 = inlined_call_operand.hbm [shape: f32[2,4,8], index: 3, kind: input, shape index: {}]   ;;  %s424_s4 = inlined_call_operand.hbm [shape: f32[2,4,8], index: 4, kind: input, shape index: {}]   ;;  %s425_s5 = inlined_call_operand.hbm [shape: f32[4,4,8], index: 5, kind: output, shape index: {0}]   ;;  %s426_s6 = inlined_call_operand.hbm [shape: f32[2,4,8], index: 6, kind: output, shape index: {1}]  }
   0x1   :  { %13 = vsyncpa [#allocation6], 0 }
   0x2   :  { %14 = vsyncpa [#allocation4], 0 }
   0x3   :  { %15 = vsyncpa [#allocation10], 0  ;;  %s37_s23 = sshll.u32 %s423_s3, 4  ;;  %s317_s24 = smov [#allocation5]   ;;  %s38_s23 = int_to_ptr.hbm [resolvable:$true] %s37_s23 }
   0x4   :  { %s39_s25 = sshll.u32 %s317_s24, 4  ;;  %s24_s28 = sshll.u32 %s422_s2, 4  ;;  %s40_s25 = int_to_ptr.vmem [resolvable:$true] %s39_s25  ;;  %s25_s28 = int_to_ptr.hbm [resolvable:$true] %s24_s28 }
   0x5   :  { %s318_s29 = smov 64   ;;  %s319_s30 = smov 4  }
   0x6   :  { %45 = dma.hbm_to_vmem [thread:$0]  %s38_s23, 128, %s40_s25, [#allocation6], %s318_s29, %s318_s29, %s319_s30  }
   0x7   :  { %s320_s7 = smov [#allocation2]   ;;  %s50_s3 = sshll.u32 %s424_s4, 4  ;;  %s51_s3 = int_to_ptr.hbm [resolvable:$true] %s50_s3 }
   0x8   :  { %s26_s8 = sshll.u32 %s320_s7, 4  ;;  %s321_s2 = smov [#allocation7]   ;;  %s27_s8 = int_to_ptr.vmem [resolvable:$true] %s26_s8 }
   0x9   :  { %32 = dma.hbm_to_vmem [thread:$0]  %s25_s28, 128, %s27_s8, [#allocation3], %s318_s29, %s318_s29, %s319_s30  }
   0xa   :  { %s52_s11 = sshll.u32 %s321_s2, 4  ;;  %s53_s11 = int_to_ptr.vmem [resolvable:$true] %s52_s11 }
   0xb   :  { %58 = dma.hbm_to_vmem [thread:$0]  %s51_s3, 128, %s53_s11, [#allocation6], %s318_s29, %s318_s29, %s319_s30  }
   0xc   :  { %309 = dma.done.wait [#allocation3], 128  }
   0xd   :  { %310 = vsyncadd [#allocation3], 4294967168 }
   0xe   :  { %311 = dma.done.wait [#allocation6], 256  }
   0xf   :  { %312 = vsyncadd [#allocation6], 4294967040  ;;  %v322_v0 = vmov 0   ;;  %v77_v1 = vld [vmem:[%s420_s0 + $0x8] sm:$0xf]  ;;  %vm127_vm0 = vcmask 60416  }
  0x10   :  { %188 = vset.pattern.permute.xlu1 %v322_v0  ;;  %187 = vset.pattern.permute.xlu0 %v322_v0  ;;  %v75_v2 = vld [vmem:[%s420_s0] sm:$0xf]  ;;  %v78_v3 = vld [vmem:[%s420_s0 + $0xc] sm:$0xf]  ;;  %v76_v4 = vld [vmem:[%s420_s0 + $0x4] sm:$0xf] }
  0x11   :  { %97 = vperm.xlu1 %188, %v77_v1   ;;  %87 = vperm.xlu0 %187, %v75_v2   ;;  %v135_v5 = vld [vmem:[#allocation5] sm:$0xf]  ;;  %v71_v6 = vld [vmem:[%s421_s1] sm:$0xf]  ;;  %v136_v8 = vld [vmem:[#allocation5 + $0x4] sm:$0xf] }
  0x12   :  { %v137_v7 = vadd.f32 %v135_v5, %v71_v6  ;;  %s323_s21 = smov [#allocation9]   ;;  %s160_s25 = sshll.u32 %s426_s6, 4  ;;  %v72_v9 = vld [vmem:[%s421_s1 + $0x4] sm:$0xf]  ;;  %v73_v11 = vld [vmem:[%s421_s1 + $0x8] sm:$0xf]  ;;  %s161_s25 = int_to_ptr.hbm [resolvable:$true] %s160_s25 }
  0x13   :  { %s158_s22 = sshll.u32 %s323_s21, 4  ;;  %v138_v10 = vadd.f32 %v136_v8, %v72_v9  ;;  %v79_v12 = vld [vmem:[#allocation2] sm:$0xf]  ;;  %v81_v13 = vld [vmem:[#allocation7] sm:$0xf]  ;;  %s147_s3 = sshll.u32 %s425_s5, 4  ;;  %s159_s22 = int_to_ptr.vmem [resolvable:$true] %s158_s22  ;;  %s148_s3 = int_to_ptr.hbm [resolvable:$true] %s147_s3 }
  0x14   :  { %139 = vst.msk [vmem:[#allocation9] sm:$0xf] %vm127_vm0, %v137_v7  ;;  %v83_v17 = vadd.f32 %v81_v13, %v79_v12  ;;  %v74_v25 = vld [vmem:[%s421_s1 + $0xc] sm:$0xf]  ;;  %v80_v26 = vld [vmem:[#allocation2 + $0x4] sm:$0xf] }
  0x15   :  { %140 = vst.msk [vmem:[#allocation9 + $0x4] sm:$0xf] %vm127_vm0, %v138_v10  ;;  %v82_v27 = vld [vmem:[#allocation7 + $0x4] sm:$0xf]  ;;  %s324_s1 = smov [#allocation8]  }
  0x16   :  { %166 = dma.vmem_to_hbm [thread:$0]  %s159_s22, 128, %s161_s25, [#allocation10], %s318_s29, %s318_s29, %s319_s30   ;;  %v121_v22 = vmul.f32 0.05, %v83_v17  ;;  %v84_v34 = vadd.f32 %v82_v27, %v80_v26 }
  0x17   :  { %s145_s8 = sshll.u32 %s324_s1, 4  ;;  %s146_s8 = int_to_ptr.vmem [resolvable:$true] %s145_s8 }
  0x18   :  { %v122_v40 = vmul.f32 0.05, %v84_v34 }
  0x19   :  { %102 = vperm.xlu1 %188, %v78_v3   ;;  %92 = vperm.xlu0 %187, %v76_v4  }
  0x83   :  { %v98_v14 = vpop.permute.xlu1 %97  ;;  %v88_v15 = vpop.permute.xlu0 %87 }
  0x84   :  { %v107_v16 = vsub.f32 %v73_v11, %v98_v14  ;;  %v105_v18 = vsub.f32 %v71_v6, %v88_v15 }
  0x86   :  { %v117_v19 = vmul.f32 0.1, %v107_v16  ;;  %v109_v20 = vmul.f32 0.05, %v107_v16  ;;  %v113_v21 = vmul.f32 0.05, %v105_v18 }
  0x88   :  { %v111_v23 = vadd.f32 %v109_v20, %v105_v18  ;;  %v115_v24 = vsub.f32 %v107_v16, %v113_v21 }
  0x8a   :  { %v119_v28 = vsub.f32 %v115_v24, %v117_v19  ;;  %v125_v29 = vadd.f32 %v111_v23, %v88_v15 }
  0x8b   :  { %v103_v30 = vpop.permute.xlu1 %102  ;;  %v93_v31 = vpop.permute.xlu0 %92 }
  0x8c   :  { %v123_v32 = vadd.f32 %v121_v22, %v119_v28  ;;  %128 = vst.msk [vmem:[#allocation8] sm:$0xf] %vm127_vm0, %v125_v29  ;;  %v108_v33 = vsub.f32 %v74_v25, %v103_v30  ;;  %v106_v35 = vsub.f32 %v72_v9, %v93_v31 }
  0x8e   :  { %v130_v36 = vadd.f32 %v123_v32, %v98_v14  ;;  %v110_v37 = vmul.f32 0.05, %v108_v33  ;;  %v114_v38 = vmul.f32 0.05, %v106_v35  ;;  %v118_v39 = vmul.f32 0.1, %v108_v33 }
  0x90   :  { %133 = vst.msk [vmem:[#allocation8 + $0x8] sm:$0xf] %vm127_vm0, %v130_v36  ;;  %v112_v41 = vadd.f32 %v110_v37, %v106_v35  ;;  %v116_v42 = vsub.f32 %v108_v33, %v114_v38 }
  0x92   :  { %v120_v43 = vsub.f32 %v116_v42, %v118_v39  ;;  %v126_v44 = vadd.f32 %v112_v41, %v93_v31 }
  0x94   :  { %v124_v45 = vadd.f32 %v122_v40, %v120_v43  ;;  %129 = vst.msk [vmem:[#allocation8 + $0x4] sm:$0xf] %vm127_vm0, %v126_v44 }
  0x96   :  { %v131_v46 = vadd.f32 %v124_v45, %v103_v30 }
  0x98   :  { %134 = vst.msk [vmem:[#allocation8 + $0xc] sm:$0xf] %vm127_vm0, %v131_v46 }
  0x99   :  { %153 = dma.vmem_to_hbm [thread:$0]  %s146_s8, 256, %s148_s3, [#allocation4], %s318_s29, %s318_s29, %s319_s30  }
  0x9a   :  { %313 = dma.done.wait [#allocation4], 256  }
  0x9b   :  { %314 = vsyncadd [#allocation4], 4294967040 }
  0x9c   :  { %315 = dma.done.wait [#allocation10], 128  }
  0x9d   :  { %316 = vsyncadd [#allocation10], 4294967168 }
  0x9e   :  { %175 = vsyncpa [#allocation3], 1 }
  0x9f   :  { %176 = vsyncpa [#allocation6], 1 }
  0xa0   :  { %177 = vsyncpa [#allocation4], 1 }
  0xa1   :  { %178 = vsyncpa [#allocation10], 1 }

</bundles_post_ra>
